<compile_context>
chip_gen: v5e
topology: v5e:2x2
jax: 0.10.0
libtpu: 0.0.40
codegen_flags: <defaults>
</compile_context>

<pallas_src>
import jax
import jax.numpy as jnp
from jax.experimental import pallas as pl
from jax.experimental.pallas import tpu as pltpu

_LANE = 128
_SUB = 8


def _dice_partial_kernel(p_ref, g_ref, inter_ref, union_ref,
                         inter_acc, union_acc):
    """Per-batch-element, per-channel partial sums for the dice loss.

    Grid = (N, K): axis 0 ('parallel') over batch, axis 1 ('arbitrary') over
    reduction tiles.  Blocks are (1, C, TS, 128); accumulators are (C, 128)
    so the steady state keeps lanes/sublanes full and the cross-lane reduce
    happens only once per batch element in the finalize step.
    """
    k = pl.program_id(1)

    @pl.when(k == 0)
    def _():
        inter_acc[...] = jnp.zeros_like(inter_acc)
        union_acc[...] = jnp.zeros_like(union_acc)

    p = p_ref[0].astype(jnp.float32)   # (C, TS, 128)
    g = g_ref[0].astype(jnp.float32)   # (C, TS, 128)

    # Per-channel partial reductions over the sublane (TS) axis; keep lanes.
    inter_acc[...] += jnp.sum(p * g, axis=1)        # (C, 128)
    union_acc[...] += jnp.sum(p * p + g, axis=1)    # (C, 128)

    @pl.when(k == pl.num_programs(1) - 1)
    def _():
        # Lane reduce once per batch element; write (1, C, 1) partials.
        inter_ref[...] = jnp.sum(inter_acc[...], axis=1, keepdims=True)[None]
        union_ref[...] = jnp.sum(union_acc[...], axis=1, keepdims=True)[None]


def dice_loss_joint(x, y, index=0, priority=1.0, *, block_rows=512):
    """JAX/Pallas equivalent of Dice_loss_joint.forward(x, y)."""
    xp = x[index]
    yp = y[index]
    assert xp.shape == yp.shape
    N, C = int(xp.shape[0]), int(xp.shape[1])
    S = 1
    for d in xp.shape[2:]:
        S *= int(d)

    pred = xp.reshape(N, C, S)   # free (contiguous) view, no transpose
    gt = yp.reshape(N, C, S)

    # Lay the reduction axis out as (rows, 128) per channel: lanes full and
    # sublanes full (rows per block is a multiple of 8) even when C < 8.
    s_rows = -(-S // _LANE)
    rows_rounded = -(-s_rows // _SUB) * _SUB

    itemsize = jnp.dtype(pred.dtype).itemsize
    # Keep the double-buffered input footprint (2 inputs x 2 buffers) under
    # ~8 MiB so the default scoped-VMEM limits are fine on v5e/v6e/v7x.
    vmem_budget = 8 * 1024 * 1024
    max_rows = max(_SUB,
                   (vmem_budget // (2 * 2 * C * _LANE * itemsize)) // _SUB * _SUB)
    ts = min(max(_SUB, (int(block_rows) // _SUB) * _SUB), rows_rounded, max_rows)

    num_tiles = -(-rows_rounded // ts)
    s_pad = num_tiles * ts * _LANE
    if s_pad != S:
        # Zero padding contributes 0 to both intersection and union sums.
        pred = jnp.pad(pred, ((0, 0), (0, 0), (0, s_pad - S)))
        gt = jnp.pad(gt, ((0, 0), (0, 0), (0, s_pad - S)))
    pred = pred.reshape(N, C, num_tiles * ts, _LANE)
    gt = gt.reshape(N, C, num_tiles * ts, _LANE)

    in_spec = pl.BlockSpec((1, C, ts, _LANE), lambda n, k: (n, 0, k, 0))
    out_spec = pl.BlockSpec((1, C, 1), lambda n, k: (n, 0, 0))

    inter_part, union_part = pl.pallas_call(
        _dice_partial_kernel,
        out_shape=(
            jax.ShapeDtypeStruct((N, C, 1), jnp.float32),
            jax.ShapeDtypeStruct((N, C, 1), jnp.float32),
        ),
        grid_spec=pltpu.PrefetchScalarGridSpec(
            num_scalar_prefetch=0,
            grid=(N, num_tiles),
            in_specs=[in_spec, in_spec],
            out_specs=[out_spec, out_spec],
            scratch_shapes=[
                pltpu.VMEM((C, _LANE), jnp.float32),
                pltpu.VMEM((C, _LANE), jnp.float32),
            ],
        ),
        compiler_params=pltpu.CompilerParams(
            dimension_semantics=("parallel", "arbitrary"),
        ),
    )(pred, gt)

    # Tiny epilogue in plain JAX (combines per-batch partials; race-free with
    # the 'parallel' batch axis and keeps `priority` out of the kernel).
    intersection = inter_part[:, :, 0].sum(axis=0) + 1e-6   # (C,)
    union = union_part[:, :, 0].sum(axis=0) + 2e-6          # (C,)
    dice = 2.0 * intersection / union
    return priority * (1.0 - jnp.mean(dice))


def _reference(x, y, index=0, priority=1.0):
    xp, yp = x[index], y[index]
    N, C = xp.shape[0], xp.shape[1]
    pred = xp.reshape(N, C, -1)
    gt = yp.reshape(N, C, -1)
    intersection = (pred * gt).sum(axis=(0, 2)) + 1e-6
    union = (pred ** 2 + gt).sum(axis=(0, 2)) + 2e-6
    dice = 2.0 * intersection / union
    return priority * (1.0 - jnp.mean(dice))


if __name__ == "__main__":
    key = jax.random.PRNGKey(0)
    k1, k2, k3, k4 = jax.random.split(key, 4)

    # Case 1: small 5-D shape (N, C, D, H, W); exercises the zero-pad path.
    N, C, D, H, W = 2, 4, 4, 8, 8
    x0 = jax.nn.sigmoid(jax.random.normal(k1, (N, C, D, H, W), dtype=jnp.float32))
    y0 = (jax.random.uniform(k2, (N, C, D, H, W)) > 0.5).astype(jnp.float32)
    loss0 = jax.block_until_ready(dice_loss_joint([x0], [y0], index=0, priority=1.0))
    ref0 = _reference([x0], [y0], index=0, priority=1.0)
    assert jnp.allclose(loss0, ref0, rtol=1e-5, atol=1e-6), (loss0, ref0)

    # Case 2: exercises multi-tile accumulation (num_tiles > 1) with a small
    # block_rows override, plus a non-unit priority.
    N, C, D, H, W = 2, 4, 8, 16, 16
    x1 = jax.nn.sigmoid(jax.random.normal(k3, (N, C, D, H, W), dtype=jnp.float32))
    y1 = (jax.random.uniform(k4, (N, C, D, H, W)) > 0.5).astype(jnp.float32)
    loss1 = jax.block_until_ready(
        dice_loss_joint([x1], [y1], index=0, priority=0.5, block_rows=8))
    ref1 = _reference([x1], [y1], index=0, priority=0.5)
    assert jnp.allclose(loss1, ref1, rtol=1e-5, atol=1e-6), (loss1, ref1)

    print("KERNEL_OK")
</pallas_src>

<mosaic_0001>
module attributes {stable_mosaic.version = 11 : i64} {
  func.func @_dice_partial_kernel(%arg0: i32, %arg1: i32, %arg2: memref<1x4x8x128xf32, #tpu.memory_space<vmem>>, %arg3: memref<1x4x8x128xf32, #tpu.memory_space<vmem>>, %arg4: memref<1x4x1xf32, #tpu.memory_space<vmem>>, %arg5: memref<1x4x1xf32, #tpu.memory_space<vmem>>, %arg6: memref<4x128xf32, #tpu.memory_space<vmem>>, %arg7: memref<4x128xf32, #tpu.memory_space<vmem>>) attributes {dimension_semantics = [#tpu.dimension_semantics<parallel>, #tpu.dimension_semantics<arbitrary>], iteration_bounds = array<i64: 2, 1>, scalar_prefetch = 0 : i64, scratch_operands = 2 : i64, tpu.core_type = #tpu.core_type<tc>, window_params = [{transform_indices = @transform_0, window_bounds = array<i64: 1, 4, 8, 128>}, {transform_indices = @transform_1, window_bounds = array<i64: 1, 4, 8, 128>}, {transform_indices = @transform_2, window_bounds = array<i64: 1, 4, 1>}, {transform_indices = @transform_3, window_bounds = array<i64: 1, 4, 1>}]} {
    %c0_i32 = arith.constant 0 : i32
    %0 = arith.cmpi eq, %arg1, %c0_i32 : i32
    %1 = arith.extui %0 : i1 to i32
    %c0_i32_0 = arith.constant 0 : i32
    %2 = arith.cmpi ne, %1, %c0_i32_0 : i32
    scf.if %2 {
      %cst_19 = arith.constant 0.000000e+00 : f32
      %21 = vector.broadcast %cst_19 : f32 to vector<4x128xf32>
      %c0_20 = arith.constant 0 : index
      %c0_21 = arith.constant 0 : index
      %22 = vector.load %arg6[%c0_20, %c0_21] : memref<4x128xf32, #tpu.memory_space<vmem>>, vector<4x128xf32>
      tpu.vector_store %arg6[%c0_20, %c0_21], %21 {strides = array<i32>} : memref<4x128xf32, #tpu.memory_space<vmem>>, vector<4x128xf32>,
      %cst_22 = arith.constant 0.000000e+00 : f32
      %23 = vector.broadcast %cst_22 : f32 to vector<4x128xf32>
      %c0_23 = arith.constant 0 : index
      %c0_24 = arith.constant 0 : index
      %24 = vector.load %arg7[%c0_23, %c0_24] : memref<4x128xf32, #tpu.memory_space<vmem>>, vector<4x128xf32>
      tpu.vector_store %arg7[%c0_23, %c0_24], %23 {strides = array<i32>} : memref<4x128xf32, #tpu.memory_space<vmem>>, vector<4x128xf32>,
    } else {
    }
    %c0 = arith.constant 0 : index
    %c0_1 = arith.constant 0 : index
    %c0_2 = arith.constant 0 : index
    %c0_3 = arith.constant 0 : index
    %3 = vector.load %arg2[%c0, %c0_1, %c0_2, %c0_3] : memref<1x4x8x128xf32, #tpu.memory_space<vmem>>, vector<1x4x8x128xf32>
    %4 = vector.shape_cast %3 : vector<1x4x8x128xf32> to vector<4x8x128xf32>
    %c0_4 = arith.constant 0 : index
    %c0_5 = arith.constant 0 : index
    %c0_6 = arith.constant 0 : index
    %c0_7 = arith.constant 0 : index
    %5 = vector.load %arg3[%c0_4, %c0_5, %c0_6, %c0_7] : memref<1x4x8x128xf32, #tpu.memory_space<vmem>>, vector<1x4x8x128xf32>
    %6 = vector.shape_cast %5 : vector<1x4x8x128xf32> to vector<4x8x128xf32>
    %c0_8 = arith.constant 0 : index
    %c0_9 = arith.constant 0 : index
    %7 = vector.load %arg6[%c0_8, %c0_9] : memref<4x128xf32, #tpu.memory_space<vmem>>, vector<4x128xf32>
    %8 = arith.mulf %4, %6 : vector<4x8x128xf32>
    %cst = arith.constant dense<0.000000e+00> : vector<4x128xf32>
    %9 = vector.multi_reduction <add>, %8, %cst [1] : vector<4x8x128xf32> to vector<4x128xf32>
    %10 = arith.addf %7, %9 : vector<4x128xf32>
    %c0_10 = arith.constant 0 : index
    %c0_11 = arith.constant 0 : index
    %11 = vector.load %arg6[%c0_10, %c0_11] : memref<4x128xf32, #tpu.memory_space<vmem>>, vector<4x128xf32>
    tpu.vector_store %arg6[%c0_10, %c0_11], %10 {strides = array<i32>} : memref<4x128xf32, #tpu.memory_space<vmem>>, vector<4x128xf32>,
    %c0_12 = arith.constant 0 : index
    %c0_13 = arith.constant 0 : index
    %12 = vector.load %arg7[%c0_12, %c0_13] : memref<4x128xf32, #tpu.memory_space<vmem>>, vector<4x128xf32>
    %13 = arith.mulf %4, %4 : vector<4x8x128xf32>
    %14 = arith.addf %13, %6 : vector<4x8x128xf32>
    %cst_14 = arith.constant dense<0.000000e+00> : vector<4x128xf32>
    %15 = vector.multi_reduction <add>, %14, %cst_14 [1] : vector<4x8x128xf32> to vector<4x128xf32>
    %16 = arith.addf %12, %15 : vector<4x128xf32>
    %c0_15 = arith.constant 0 : index
    %c0_16 = arith.constant 0 : index
    %17 = vector.load %arg7[%c0_15, %c0_16] : memref<4x128xf32, #tpu.memory_space<vmem>>, vector<4x128xf32>
    tpu.vector_store %arg7[%c0_15, %c0_16], %16 {strides = array<i32>} : memref<4x128xf32, #tpu.memory_space<vmem>>, vector<4x128xf32>,
    %c0_i32_17 = arith.constant 0 : i32
    %18 = arith.cmpi eq, %arg1, %c0_i32_17 : i32
    %19 = arith.extui %18 : i1 to i32
    %c0_i32_18 = arith.constant 0 : i32
    %20 = arith.cmpi ne, %19, %c0_i32_18 : i32
    scf.if %20 {
      %c0_19 = arith.constant 0 : index
      %c0_20 = arith.constant 0 : index
      %21 = vector.load %arg6[%c0_19, %c0_20] : memref<4x128xf32, #tpu.memory_space<vmem>>, vector<4x128xf32>
      %cst_21 = arith.constant dense<0.000000e+00> : vector<4xf32>
      %22 = vector.multi_reduction <add>, %21, %cst_21 [1] : vector<4x128xf32> to vector<4xf32>
      %23 = vector.shape_cast %22 : vector<4xf32> to vector<4x1xf32>
      %24 = vector.shape_cast %23 : vector<4x1xf32> to vector<1x4x1xf32>
      %c0_22 = arith.constant 0 : index
      %c0_23 = arith.constant 0 : index
      %c0_24 = arith.constant 0 : index
      %25 = vector.load %arg4[%c0_22, %c0_23, %c0_24] : memref<1x4x1xf32, #tpu.memory_space<vmem>>, vector<1x4x1xf32>
      tpu.vector_store %arg4[%c0_22, %c0_23, %c0_24], %24 {strides = array<i32>} : memref<1x4x1xf32, #tpu.memory_space<vmem>>, vector<1x4x1xf32>,
      %c0_25 = arith.constant 0 : index
      %c0_26 = arith.constant 0 : index
      %26 = vector.load %arg7[%c0_25, %c0_26] : memref<4x128xf32, #tpu.memory_space<vmem>>, vector<4x128xf32>
      %cst_27 = arith.constant dense<0.000000e+00> : vector<4xf32>
      %27 = vector.multi_reduction <add>, %26, %cst_27 [1] : vector<4x128xf32> to vector<4xf32>
      %28 = vector.shape_cast %27 : vector<4xf32> to vector<4x1xf32>
      %29 = vector.shape_cast %28 : vector<4x1xf32> to vector<1x4x1xf32>
      %c0_28 = arith.constant 0 : index
      %c0_29 = arith.constant 0 : index
      %c0_30 = arith.constant 0 : index
      %30 = vector.load %arg5[%c0_28, %c0_29, %c0_30] : memref<1x4x1xf32, #tpu.memory_space<vmem>>, vector<1x4x1xf32>
      tpu.vector_store %arg5[%c0_28, %c0_29, %c0_30], %29 {strides = array<i32>} : memref<1x4x1xf32, #tpu.memory_space<vmem>>, vector<1x4x1xf32>,
    } else {
    }
    return
  }
  func.func @transform_0(%arg0: i32, %arg1: i32) -> (i32, i32, i32, i32) {
    %c0_i32 = arith.constant 0 : i32
    %c0_i32_0 = arith.constant 0 : i32
    %c0_i32_1 = arith.constant 0 : i32
    return %arg0, %c0_i32, %arg1, %c0_i32_0 : i32, i32, i32, i32
  }
  func.func @transform_1(%arg0: i32, %arg1: i32) -> (i32, i32, i32, i32) {
    %c0_i32 = arith.constant 0 : i32
    %c0_i32_0 = arith.constant 0 : i32
    %c0_i32_1 = arith.constant 0 : i32
    return %arg0, %c0_i32, %arg1, %c0_i32_0 : i32, i32, i32, i32
  }
  func.func @transform_2(%arg0: i32, %arg1: i32) -> (i32, i32, i32) {
    %c0_i32 = arith.constant 0 : i32
    %c0_i32_0 = arith.constant 0 : i32
    %c0_i32_1 = arith.constant 0 : i32
    return %arg0, %c0_i32, %c0_i32_0 : i32, i32, i32
  }
  func.func @transform_3(%arg0: i32, %arg1: i32) -> (i32, i32, i32) {
    %c0_i32 = arith.constant 0 : i32
    %c0_i32_0 = arith.constant 0 : i32
    %c0_i32_1 = arith.constant 0 : i32
    return %arg0, %c0_i32, %c0_i32_0 : i32, i32, i32
  }
}

</mosaic_0001>

<bundles_post_ra>
// kernel: tpu_custom_call.1
= control target key start
LH: loop header
LB: loop body
LE: loop exit
PB: predicated region body
PF: predicated region fallthrough
CT: control target
= control target key end

     0   :  { %9 = vsyncpa [#allocation5], 0  ;;  %s845_s0 = inlined_call_operand.hbm [shape: f32[2,4,8,128], index: 0, kind: input, shape index: {}]   ;;  %s846_s1 = inlined_call_operand.hbm [shape: f32[2,4,8,128], index: 1, kind: input, shape index: {}]   ;;  %s847_s2 = inlined_call_operand.vmem [shape: f32[2,4,1], index: 2, kind: output, shape index: {0}]   ;;  %s848_s3 = inlined_call_operand.vmem [shape: f32[2,4,1], index: 3, kind: output, shape index: {1}]  }
   0x1   :  { %11 = vsyncpa [#allocation5 + $0x1], 0 }
   0x2   :  { %12 = vsyncpa [#allocation7], 0 }
   0x3   :  { %14 = vsyncpa [#allocation7 + $0x1], 0  ;;  %s728_s12 = smov 0   ;;  %s730_s13 = smov 0  }
   0x4   :  { %s732_s14 = smov 0   ;;  %s734_s15 = smov 0  }
   0x5   :  { %s736_s16 = smov 0   ;;  %s738_s17 = smov 0  }
   0x6 LB: > { %s507_s18 = sadd.s32 4294967295, %s703_s17   ;;  %s32_s19 = sadd.s32 1, %s699_s16  ;;  %s703_s17 = sphi %s738_s17, %s20_s17   ;;  %s699_s16 = sphi %s736_s16, %s856_s16   ;;  %s695_s15 = sphi %s734_s15, %s855_s15   ;;  %s691_s14 = sphi %s732_s14, %s854_s14   ;;  %s687_s13 = sphi %s730_s13, %s853_s13   ;;  %s683_s12 = sphi %s728_s12, %s852_s12  }
   0x7   : > { %p34_p0 = scmp.ge.s32.totalorder %s32_s19, 2  ;;  %s41_s20 = sadd.s32 1, %s691_s14 }
   0x8   : > { %p48_p1 = scmp.ne.s32.totalorder %s691_s14, %s687_s13  ;;  %p49_p2 = scmp.eq.s32.totalorder %s703_s17, 0 }
   0x9   : > { %s858_s19 = smov (%p34_p0, %s32_s19), 0  ;;  %p54_p4 = scmp.ne.s32.totalorder %s687_s13, %s683_s12 }
   0xa   : > { %p764_p3 = por %p49_p2, %p48_p1  ;;  %s36_s22 = ssub.s32 %s699_s16, %s858_s19 }
   0xb   : > { %p55_p5 = scmp.eq.s32.totalorder %s507_s18, 0  ;;  %p39_p6 = scmp.eq.s32.totalorder %s36_s22, 0 }
   0xc   : > { %p537_p8 = scmp.lt.s32.totalorder %s703_s17, 2  ;;  %s780_s25 = sand.u32 1, %s691_s14  }
   0xd   : > { %p771_p7 = por %p55_p5, %p54_p4  ;;  %s524_s26 = sshll.u32 %s699_s16, 5 }
   0xe   : > { %s777_s24 = scalar_select %p39_p6, %s691_s14, %s41_s20  }
   0xf   : > { %s511_s27 = sshll.u32 %s780_s25, 5  ;;  %s168_s30 = scalar_lea.hbm %s845_s0, %s524_s26 }
  0x10   : > { %s169_s4 = sshll.u32 %s168_s30, 4  ;;  %s162_s5 = scalar_lea.vmem [#allocation4], %s511_s27  ;;  %s170_s4 = int_to_ptr.hbm [resolvable:$true] %s169_s4 }
  0x11   : > { %s171_s6 = sshll.u32 %s162_s5, 4  ;;  %p789_p9 = pnand %p537_p8, %p764_p3  ;;  %s172_s6 = int_to_ptr.vmem [resolvable:$true] %s171_s6 }
  0x12   : > { %p517_p10 = scmp.ge.s32.totalorder %s703_s17, 1  ;;  %p202_p11 = scmp.lt.s32.totalorder %s703_s17, 3 }
  0x13   : > { %s159_s8 = scalar_lea.sflag [#allocation5], %s780_s25  ;;  %s705_s9 = smov 128  }
  0x14   : > { %s706_s10 = smov 8   ;;  %p203_p12 = pnand %p517_p10, %p202_p11 }
  0x15   : > { %533 = dma.hbm_to_vmem [thread:$0]  (!%p789_p9), %s170_s4, 512, %s172_s6, %s159_s8, %s705_s9, %s705_s9, %s706_s10  }
  0x16   : > { %s191_s18 = scalar_lea.hbm %s846_s1, %s524_s26  ;;  %s185_s21 = scalar_lea.vmem [#allocation6], %s511_s27 }
  0x17   : > { %s192_s20 = sshll.u32 %s191_s18, 4  ;;  %s194_s22 = sshll.u32 %s185_s21, 4  ;;  %s193_s20 = int_to_ptr.hbm [resolvable:$true] %s192_s20  ;;  %s195_s22 = int_to_ptr.vmem [resolvable:$true] %s194_s22 }
  0x18   : > { %s182_s28 = scalar_lea.sflag [#allocation7], %s780_s25  ;;  %206 = sbr.rel (%p203_p12) target bundleno = 188 (0xbc), region = 28 }
  0x19   : > { %536 = dma.hbm_to_vmem [thread:$0]  (!%p789_p9), %s193_s20, 512, %s195_s22, %s182_s28, %s705_s9, %s705_s9, %s706_s10  }
  0x1a   : > { %s208_s29 = sand.u32 (!%p203_p12), 1, %s687_s13  }
  0x1b   : > { %s518_s30 = sshll.u32 (!%p203_p12), %s208_s29, 5  ;;  %s209_s5 = scalar_lea.sflag (!%p203_p12), [#allocation5], %s208_s29 }
  0x1c   : > { %s212_s4 = scalar_lea.vmem (!%p203_p12), [#allocation4], %s518_s30 }
  0x1d   : > { %674 = dma.done.wait (%p771_p7), %s209_s5, 512  }
  0x1e   : > { %676 = vsyncadd (%p771_p7), %s209_s5, 4294966784  ;;  %s219_s26 = scalar_lea.sflag [#allocation7], %s208_s29  ;;  %s222_s27 = scalar_lea.vmem [#allocation6], %s518_s30 }
  0x1f   : > { %678 = dma.done.wait (%p771_p7), %s219_s26, 512  }
  0x20   : > { %680 = vsyncadd (%p771_p7), %s219_s26, 4294966784  ;;  %v707_v0 = vmov 0.0   ;;  %v268_v1 = vld [vmem:[%s212_s4] sm:$0xff]  ;;  %v269_v2 = vld [vmem:[%s212_s4 + $0x8] sm:$0xff]  ;;  %vm309_vm0 = vcmask 1041409   ;;  %vm311_vm1 = vcmask 1042434  }
  0x21   : > { %266 = vst [vmem:[#allocation2] sm:$0xf] %v707_v0  ;;  %v270_v3 = vld [vmem:[%s212_s4 + $0x10] sm:$0xff]  ;;  %v271_v4 = vld [vmem:[%s212_s4 + $0x18] sm:$0xff]  ;;  %v272_v5 = vld [vmem:[%s222_s27] sm:$0xff]  ;;  %v319_v7 = vmul.f32 %v268_v1, %v268_v1  ;;  %v320_v8 = vmul.f32 %v269_v2, %v269_v2  ;;  %vm313_vm2 = vcmask 1043459  }
  0x22   : > { %267 = vst [vmem:[#allocation3] sm:$0xf] %v707_v0  ;;  %v273_v6 = vld [vmem:[%s222_s27 + $0x8] sm:$0xff]  ;;  %v321_v9 = vmul.f32 %v270_v3, %v270_v3  ;;  %v274_v10 = vld [vmem:[%s222_s27 + $0x10] sm:$0xff]  ;;  %v275_v11 = vld [vmem:[%s222_s27 + $0x18] sm:$0xff]  ;;  %v277_v12 = vmul.f32 %v272_v5, %v268_v1  ;;  %v322_v14 = vmul.f32 %v271_v4, %v271_v4  ;;  %vm365_vm3 = vcmask 1043456  }
  0x23   : > { %v278_v13 = vmul.f32 %v273_v6, %v269_v2  ;;  %v279_v15 = vmul.f32 %v274_v10, %v270_v3  ;;  %v280_v16 = vmul.f32 %v275_v11, %v271_v4  ;;  %v323_v17 = vadd.f32 %v319_v7, %v272_v5  ;;  %p254_p13 = scmp.lt.s32.totalorder %s695_s15, 1 }
  0x24   : > { %v324_v18 = vadd.f32 %v320_v8, %v273_v6  ;;  %v281_v19 = vrot.slane %v277_v12, 4  ;;  %v325_v21 = vadd.f32 %v321_v9, %v274_v10  ;;  %v326_v22 = vadd.f32 %v322_v14, %v275_v11 }
  0x25   : > { %v287_v20 = vrot.slane %v278_v13, 4  ;;  %v293_v23 = vrot.slane %v279_v15, 4  ;;  %v299_v24 = vrot.slane %v280_v16, 4  ;;  %v327_v25 = vrot.slane %v323_v17, 4  ;;  %s860_s15 = smov (!%p254_p13, %s695_s15), 1 }
  0x26   : > { %v333_v26 = vrot.slane %v324_v18, 4  ;;  %v282_v27 = vadd.f32 %v281_v19, %v277_v12  ;;  %v339_v29 = vrot.slane %v325_v21, 4  ;;  %v345_v30 = vrot.slane %v326_v22, 4  ;;  %s520_s23 = sshll.u32 %s860_s15, 2 }
  0x27   : > { %v288_v28 = vadd.f32 %v287_v20, %v278_v13  ;;  %v294_v31 = vadd.f32 %v293_v23, %v279_v15  ;;  %v300_v32 = vadd.f32 %v299_v24, %v280_v16  ;;  %v328_v33 = vadd.f32 %v327_v25, %v323_v17  ;;  %s257_s7 = scalar_lea.vmem %s847_s2, %s520_s23  ;;  %s261_s10 = scalar_lea.vmem %s848_s3, %s520_s23 }
  0x28   : > { %v334_v34 = vadd.f32 %v333_v26, %v324_v18  ;;  %v283_v35 = vrot.slane %v282_v27, 2  ;;  %v340_v37 = vadd.f32 %v339_v29, %v325_v21  ;;  %v346_v38 = vadd.f32 %v345_v30, %v326_v22  ;;  %v276_v3 = vld [vmem:[#allocation2] sm:$0xf] }
  0x29   : > { %v289_v36 = vrot.slane %v288_v28, 2  ;;  %v295_v39 = vrot.slane %v294_v31, 2  ;;  %v301_v40 = vrot.slane %v300_v32, 2  ;;  %v329_v41 = vrot.slane %v328_v33, 2  ;;  %v318_v8 = vld [vmem:[#allocation3] sm:$0xf] }
  0x2a   : > { %v335_v42 = vrot.slane %v334_v34, 2  ;;  %v284_v43 = vadd.f32 %v283_v35, %v282_v27  ;;  %v341_v45 = vrot.slane %v340_v37, 2  ;;  %v347_v46 = vrot.slane %v346_v38, 2 }
  0x2b   : > { %v290_v44 = vadd.f32 %v289_v36, %v288_v28  ;;  %v296_v47 = vadd.f32 %v295_v39, %v294_v31  ;;  %v302_v48 = vadd.f32 %v301_v40, %v300_v32  ;;  %v330_v49 = vadd.f32 %v329_v41, %v328_v33 }
  0x2c   : > { %v336_v50 = vadd.f32 %v335_v42, %v334_v34  ;;  %v285_v51 = vrot.slane %v284_v43, 1  ;;  %v342_v53 = vadd.f32 %v341_v45, %v340_v37  ;;  %v348_v54 = vadd.f32 %v347_v46, %v346_v38 }
  0x2d   : > { %v291_v52 = vrot.slane %v290_v44, 1  ;;  %v297_v55 = vrot.slane %v296_v47, 1  ;;  %v303_v56 = vrot.slane %v302_v48, 1  ;;  %v331_v57 = vrot.slane %v330_v49, 1 }
  0x2e   : > { %v337_v58 = vrot.slane %v336_v50, 1  ;;  %v286_v59 = vadd.f32 %v285_v51, %v284_v43  ;;  %v343_v61 = vrot.slane %v342_v53, 1  ;;  %v349_v62 = vrot.slane %v348_v54, 1 }
  0x2f   : > { %v292_v60 = vadd.f32 %v291_v52, %v290_v44  ;;  %v298_v63 = vadd.f32 %v297_v55, %v296_v47  ;;  %v304_v0 = vadd.f32 %v303_v56, %v302_v48  ;;  %v332_v1 = vadd.f32 %v331_v57, %v330_v49 }
  0x30   : > { %v338_v2 = vadd.f32 %v337_v58, %v336_v50  ;;  %v344_v5 = vadd.f32 %v343_v61, %v342_v53  ;;  %v350_v6 = vadd.f32 %v349_v62, %v348_v54  ;;  %vm369_vm4 = vcmask 3072  }
  0x31   : > { %v310_v4 = vsel %vm309_vm0, %v292_v60, %v286_v59 }
  0x32   : > { %v312_v7 = vsel %vm311_vm1, %v298_v63, %v310_v4  ;;  %v355_v9 = vsel %vm309_vm0, %v338_v2, %v332_v1 }
  0x33   : > { %v314_v10 = vsel %vm313_vm2, %v304_v0, %v312_v7  ;;  %v356_v11 = vsel %vm311_vm1, %v344_v5, %v355_v9 }
  0x34   : > { %v316_v12 = vadd.f32 %v314_v10, %v276_v3  ;;  %v357_v13 = vsel %vm313_vm2, %v350_v6, %v356_v11 }
  0x35   : > { %v359_v14 = vadd.f32 %v357_v13, %v318_v8 }
  0x36   : > { %317 = vst [vmem:[#allocation2] sm:$0xf] %v316_v12 }
  0x37   : > { %360 = vst [vmem:[#allocation3] sm:$0xf] %v359_v14 }
  0x3d   : > { %v364_v15 = vld [vmem:[#allocation2] sm:$0xf] }
  0x3e   : > { %v366_v16 = vsel %vm365_vm3, %v364_v15, 0.0  ;;  %v371_v17 = vld [vmem:[#allocation3] sm:$0xf] }
  0x3f   : > { %367 = vadd.xlane.f32.xlu0 %v366_v16  ;;  %v372_v18 = vsel %vm365_vm3, %v371_v17, 0.0 }
  0x47   : > { %373 = vadd.xlane.f32.xlu0 %v372_v18 }
  0xb2   : > { %v368_v19 = vpop.xlane.xlu0 %367 }
  0xb3   : > { %370 = vst.msk [vmem:[%s257_s7] sm:$0xf] %vm369_vm4, %v368_v19 }
  0xba   : > { %v374_v20 = vpop.xlane.xlu0 %373 }
  0xbb   : > { %375 = vst.msk [vmem:[%s261_s10] sm:$0xf] %vm369_vm4, %v374_v20 }
  0xbc PF: > { %s20_s17 = sadd.s32 1, %s703_s17   ;;  %s852_s12 = smov %s687_s13 }
  0xbd   : > { %p17_p0 = scmp.ge.s32.totalorder %s20_s17, 4   ;;  %s853_s13 = smov %s691_s14 }
  0xbe   : > { %s854_s14 = smov %s777_s24  ;;  %s855_s15 = smov %s699_s16 }
  0xbf   : > { %s856_s16 = smov %s858_s19  ;;  %19 = sbr.rel (!%p17_p0) target bundleno = 6 (0x6), region = 101 }
  0xc4   :  { %409 = vsyncpa [#allocation5], 1 }
  0xc5   :  { %411 = vsyncpa [#allocation5 + $0x1], 1 }
  0xc6   :  { %412 = vsyncpa [#allocation7], 1 }
  0xc7   :  { %414 = vsyncpa [#allocation7 + $0x1], 1 }

</bundles_post_ra>
